<compile_context>
chip_gen: v7x
topology: tpu7x:2x2x1
jax: 0.10.0
libtpu: 0.0.40
codegen_flags: <defaults>
</compile_context>

<pallas_src>
import math

import jax
import jax.numpy as jnp
from jax.experimental import pallas as pl
from jax.experimental.pallas import tpu as pltpu

LN_EPS = 1e-12  # standard BERT LayerNorm eps


def _round_up(x, m):
    return ((x + m - 1) // m) * m


def prepare_dense_weight(weight):
    """One-time (parameter-load time) transform: torch (out, in) -> (in, out)."""
    return jnp.asarray(weight).T


def _bert_self_output_kernel(x_ref, res_ref, wt_ref, b_ref, g_ref, beta_ref, o_ref):
    # x_ref:   (tm, H)  attention output tile
    # res_ref: (tm, H)  residual tile
    # wt_ref:  (H, H)   dense weight, pre-transposed (in, out), resident
    # b_ref:   (1, H)   dense bias
    # g_ref:   (1, H)   LayerNorm gamma
    # beta_ref:(1, H)   LayerNorm beta

    # Dense in the native input dtype (bf16 inputs hit the MXU bf16 path),
    # accumulating in f32.
    h = jnp.dot(x_ref[...], wt_ref[...], preferred_element_type=jnp.float32)

    # TODO(synk): dropout omitted (eval / inference mode -> identity).

    # Residual add + per-row LayerNorm over the hidden axis, all in f32.
    y = h + b_ref[...].astype(jnp.float32) + res_ref[...].astype(jnp.float32)

    inv_h = jnp.float32(1.0 / y.shape[-1])
    mean = jnp.sum(y, axis=-1, keepdims=True) * inv_h          # XLU reduction
    centered = y - mean
    var = jnp.sum(centered * centered, axis=-1, keepdims=True) * inv_h
    inv_std = jax.lax.rsqrt(var + LN_EPS)                      # EUP
    # Fused scale/shift into the store: only y / centered live as (tm,H) f32.
    o_ref[...] = (
        centered * inv_std * g_ref[...].astype(jnp.float32)
        + beta_ref[...].astype(jnp.float32)
    ).astype(o_ref.dtype)


def _make_call(T, H, tm, grid, out_dtype, vmem_limit, single_buffer_params):
    # Constant-index params (weight / bias / gamma / beta) don't need double
    # buffers; request single buffering to free VMEM for larger token tiles.
    pm = pl.Buffered(1) if single_buffer_params else None
    return pl.pallas_call(
        _bert_self_output_kernel,
        out_shape=jax.ShapeDtypeStruct((T, H), out_dtype),
        grid_spec=pltpu.PrefetchScalarGridSpec(
            num_scalar_prefetch=0,
            grid=grid,
            in_specs=[
                pl.BlockSpec((tm, H), lambda i: (i, 0)),                   # x tile
                pl.BlockSpec((tm, H), lambda i: (i, 0)),                   # residual tile
                pl.BlockSpec((H, H), lambda i: (0, 0), pipeline_mode=pm),  # weight (resident)
                pl.BlockSpec((1, H), lambda i: (0, 0), pipeline_mode=pm),  # bias
                pl.BlockSpec((1, H), lambda i: (0, 0), pipeline_mode=pm),  # gamma
                pl.BlockSpec((1, H), lambda i: (0, 0), pipeline_mode=pm),  # beta
            ],
            out_specs=pl.BlockSpec((tm, H), lambda i: (i, 0)),
        ),
        compiler_params=pltpu.CompilerParams(
            dimension_semantics=("parallel",),   # grid axis shards across TCs on v7x
            vmem_limit_bytes=vmem_limit,
        ),
    )


def bert_self_output(hidden_states, input_tensor, wt, bias, gamma, beta, *,
                     tm=512, cast_to_bf16=False):
    """Fused BertSelfOutput.

    hidden_states, input_tensor: (B, S, H)
    wt: dense weight pre-transposed to (H_in, H_out) -- see prepare_dense_weight
    bias, gamma, beta: (H,)
    tm: token tile (rows per grid step). Clamped to the token count and to a
        grid-length floor (>=4 steps) for megacore / pipeline depth.
    cast_to_bf16: cast activations + weight to bf16 before the matmul
        (recommended on v5e for f32 callers; f32 accumulation + f32 LN kept).
    """
    B, S, H = hidden_states.shape
    T = B * S

    x2 = hidden_states.reshape(T, H)
    r2 = input_tensor.reshape(T, H)
    if cast_to_bf16:
        x2 = x2.astype(jnp.bfloat16)
        r2 = r2.astype(jnp.bfloat16)
        wt = wt.astype(jnp.bfloat16)
    b2 = bias.reshape(1, H)
    g2 = gamma.reshape(1, H)
    be2 = beta.reshape(1, H)

    # Token tile: sublane-aligned, never exceeding the (rounded-up) token count.
    tm = max(8, _round_up(min(tm, _round_up(T, 8)), 8))
    # Grid-length floor: keep >=4 steps when there are enough tokens so v7x's
    # two TensorCores both get work and double-buffering can pipeline.
    min_steps = 4
    if T >= min_steps * 256:
        tm = min(tm, _round_up(pl.cdiv(T, min_steps), 256))
    grid = (pl.cdiv(T, tm),)   # partial last block, no jnp.pad / extra HBM pass

    # VMEM budget: x/res/out double-buffered, weight possibly double (fallback),
    # plus the kernel-internal f32 LN temps (y, centered, epilogue scratch).
    act_bytes = tm * H * x2.dtype.itemsize
    w_bytes = H * H * wt.dtype.itemsize
    f32_tmp_bytes = 3 * tm * H * 4
    vmem_est = 3 * 2 * act_bytes + 2 * w_bytes + f32_tmp_bytes + 8 * H * 4
    vmem_limit = int(min(max(int(1.5 * vmem_est), 32 << 20), 48 << 20))

    out_dtype = hidden_states.dtype
    try:
        out = _make_call(T, H, tm, grid, out_dtype, vmem_limit, True)(
            x2, r2, wt, b2, g2, be2)
    except Exception:
        # Fallback if pipeline_mode=pl.Buffered(1) is unsupported by this
        # jax/Mosaic build: identical kernel, default (double) buffering.
        # NOTE: this eager-call fallback is for trace/compile-time errors; under
        # jax.jit wrap the choice outside the jit boundary instead.
        out = _make_call(T, H, tm, grid, out_dtype, vmem_limit, False)(
            x2, r2, wt, b2, g2, be2)

    return out.reshape(B, S, H)


def _reference(hidden_states, input_tensor, weight, bias, gamma, beta):
    h = jnp.einsum("bsh,oh->bso", hidden_states, weight) + bias
    y = h + input_tensor
    mean = jnp.mean(y, axis=-1, keepdims=True)
    var = jnp.mean((y - mean) ** 2, axis=-1, keepdims=True)
    return (y - mean) * jax.lax.rsqrt(var + LN_EPS) * gamma + beta


def _run_case(key, B, S, H, tm):
    k1, k2, k3, k4 = jax.random.split(key, 4)
    hidden_states = jax.random.normal(k1, (B, S, H), dtype=jnp.float32)
    input_tensor = jax.random.normal(k2, (B, S, H), dtype=jnp.float32)

    # Deterministic synthetic params (nn.Linear / LayerNorm shapes).
    bound = 1.0 / math.sqrt(H)
    weight = jax.random.uniform(k3, (H, H), minval=-bound, maxval=bound,
                                dtype=jnp.float32)   # torch layout (out, in)
    bias = jax.random.uniform(k4, (H,), minval=-bound, maxval=bound,
                              dtype=jnp.float32)
    gamma = jnp.ones((H,), dtype=jnp.float32)
    beta = jnp.zeros((H,), dtype=jnp.float32)

    # Pre-transpose the dense weight ONCE at parameter-load time.
    wt = prepare_dense_weight(weight)

    out = bert_self_output(hidden_states, input_tensor, wt, bias, gamma, beta, tm=tm)
    out = jax.block_until_ready(out)

    ref = _reference(hidden_states, input_tensor, weight, bias, gamma, beta)
    assert out.shape == (B, S, H)
    assert jnp.allclose(out, ref, atol=1e-4, rtol=1e-4), \
        f"mismatch vs reference for shape {(B, S, H)}"


if __name__ == "__main__":
    key = jax.random.PRNGKey(0)
    k_a, k_b = jax.random.split(key)

    # Small demo shape (single partial block).
    _run_case(k_a, B=2, S=8, H=32, tm=512)
    # Ragged token count exercising the partial-last-block path (T=24, tm=16).
    _run_case(k_b, B=2, S=12, H=128, tm=16)

    print("KERNEL_OK")
</pallas_src>

<mosaic_0001>
module attributes {stable_mosaic.version = 11 : i64} {
  func.func @_bert_self_output_kernel(%arg0: i32, %arg1: memref<16x32xf32, #tpu.memory_space<vmem>>, %arg2: memref<16x32xf32, #tpu.memory_space<vmem>>, %arg3: memref<32x32xf32, #tpu.memory_space<vmem>>, %arg4: memref<1x32xf32, #tpu.memory_space<vmem>>, %arg5: memref<1x32xf32, #tpu.memory_space<vmem>>, %arg6: memref<1x32xf32, #tpu.memory_space<vmem>>, %arg7: memref<16x32xf32, #tpu.memory_space<vmem>>) attributes {dimension_semantics = [#tpu.dimension_semantics<parallel>], iteration_bounds = array<i64: 1>, scalar_prefetch = 0 : i64, scratch_operands = 0 : i64, tpu.core_type = #tpu.core_type<tc>, window_params = [{transform_indices = @transform_0, window_bounds = array<i64: 16, 32>}, {transform_indices = @transform_1, window_bounds = array<i64: 16, 32>}, {pipeline_mode = #tpu.pipeline_mode<synchronous>, transform_indices = @transform_2, window_bounds = array<i64: 32, 32>}, {pipeline_mode = #tpu.pipeline_mode<synchronous>, transform_indices = @transform_3, window_bounds = array<i64: 1, 32>}, {pipeline_mode = #tpu.pipeline_mode<synchronous>, transform_indices = @transform_4, window_bounds = array<i64: 1, 32>}, {pipeline_mode = #tpu.pipeline_mode<synchronous>, transform_indices = @transform_5, window_bounds = array<i64: 1, 32>}, {transform_indices = @transform_6, window_bounds = array<i64: 16, 32>}]} {
    %c0 = arith.constant 0 : index
    %c0_0 = arith.constant 0 : index
    %0 = vector.load %arg1[%c0, %c0_0] : memref<16x32xf32, #tpu.memory_space<vmem>>, vector<16x32xf32>
    %c0_1 = arith.constant 0 : index
    %c0_2 = arith.constant 0 : index
    %1 = vector.load %arg3[%c0_1, %c0_2] : memref<32x32xf32, #tpu.memory_space<vmem>>, vector<32x32xf32>
    %cst = arith.constant dense<0.000000e+00> : vector<16x32xf32>
    %2 = tpu.matmul %0, %1, %cst {dimension_numbers = #tpu.dot_dimension_numbers<[1], [0], [0], [1], [0, 0, 1, 1], [], []>} : vector<16x32xf32>, vector<32x32xf32>, vector<16x32xf32> -> vector<16x32xf32>
    %c0_3 = arith.constant 0 : index
    %c0_4 = arith.constant 0 : index
    %3 = vector.load %arg4[%c0_3, %c0_4] : memref<1x32xf32, #tpu.memory_space<vmem>>, vector<1x32xf32>
    %4 = vector.broadcast %3 : vector<1x32xf32> to vector<16x32xf32>
    %5 = arith.addf %2, %4 : vector<16x32xf32>
    %c0_5 = arith.constant 0 : index
    %c0_6 = arith.constant 0 : index
    %6 = vector.load %arg2[%c0_5, %c0_6] : memref<16x32xf32, #tpu.memory_space<vmem>>, vector<16x32xf32>
    %7 = arith.addf %5, %6 : vector<16x32xf32>
    %cst_7 = arith.constant dense<0.000000e+00> : vector<16xf32>
    %8 = vector.multi_reduction <add>, %7, %cst_7 [1] : vector<16x32xf32> to vector<16xf32>
    %9 = vector.shape_cast %8 : vector<16xf32> to vector<16x1xf32>
    %cst_8 = arith.constant 3.125000e-02 : f32
    %10 = vector.broadcast %cst_8 : f32 to vector<16x1xf32>
    %11 = arith.mulf %9, %10 : vector<16x1xf32>
    %12 = vector.broadcast %11 : vector<16x1xf32> to vector<16x32xf32>
    %13 = arith.subf %7, %12 : vector<16x32xf32>
    %14 = arith.mulf %13, %13 : vector<16x32xf32>
    %cst_9 = arith.constant dense<0.000000e+00> : vector<16xf32>
    %15 = vector.multi_reduction <add>, %14, %cst_9 [1] : vector<16x32xf32> to vector<16xf32>
    %16 = vector.shape_cast %15 : vector<16xf32> to vector<16x1xf32>
    %cst_10 = arith.constant 3.125000e-02 : f32
    %17 = vector.broadcast %cst_10 : f32 to vector<16x1xf32>
    %18 = arith.mulf %16, %17 : vector<16x1xf32>
    %cst_11 = arith.constant 9.99999996E-13 : f32
    %19 = vector.broadcast %cst_11 : f32 to vector<16x1xf32>
    %20 = arith.addf %18, %19 : vector<16x1xf32>
    %21 = math.rsqrt %20 : vector<16x1xf32>
    %22 = vector.broadcast %21 : vector<16x1xf32> to vector<16x32xf32>
    %23 = arith.mulf %13, %22 : vector<16x32xf32>
    %c0_12 = arith.constant 0 : index
    %c0_13 = arith.constant 0 : index
    %24 = vector.load %arg5[%c0_12, %c0_13] : memref<1x32xf32, #tpu.memory_space<vmem>>, vector<1x32xf32>
    %25 = vector.broadcast %24 : vector<1x32xf32> to vector<16x32xf32>
    %26 = arith.mulf %23, %25 : vector<16x32xf32>
    %c0_14 = arith.constant 0 : index
    %c0_15 = arith.constant 0 : index
    %27 = vector.load %arg6[%c0_14, %c0_15] : memref<1x32xf32, #tpu.memory_space<vmem>>, vector<1x32xf32>
    %28 = vector.broadcast %27 : vector<1x32xf32> to vector<16x32xf32>
    %29 = arith.addf %26, %28 : vector<16x32xf32>
    %c0_16 = arith.constant 0 : index
    %c0_17 = arith.constant 0 : index
    %30 = vector.load %arg7[%c0_16, %c0_17] : memref<16x32xf32, #tpu.memory_space<vmem>>, vector<16x32xf32>
    tpu.vector_store %arg7[%c0_16, %c0_17], %29 {strides = array<i32>} : memref<16x32xf32, #tpu.memory_space<vmem>>, vector<16x32xf32>,
    return
  }
  func.func @transform_0(%arg0: i32) -> (i32, i32) {
    %c0_i32 = arith.constant 0 : i32
    %c0_i32_0 = arith.constant 0 : i32
    return %arg0, %c0_i32 : i32, i32
  }
  func.func @transform_1(%arg0: i32) -> (i32, i32) {
    %c0_i32 = arith.constant 0 : i32
    %c0_i32_0 = arith.constant 0 : i32
    return %arg0, %c0_i32 : i32, i32
  }
  func.func @transform_2(%arg0: i32) -> (i32, i32) {
    %c0_i32 = arith.constant 0 : i32
    %c0_i32_0 = arith.constant 0 : i32
    %c0_i32_1 = arith.constant 0 : i32
    return %c0_i32, %c0_i32_0 : i32, i32
  }
  func.func @transform_3(%arg0: i32) -> (i32, i32) {
    %c0_i32 = arith.constant 0 : i32
    %c0_i32_0 = arith.constant 0 : i32
    %c0_i32_1 = arith.constant 0 : i32
    return %c0_i32, %c0_i32_0 : i32, i32
  }
  func.func @transform_4(%arg0: i32) -> (i32, i32) {
    %c0_i32 = arith.constant 0 : i32
    %c0_i32_0 = arith.constant 0 : i32
    %c0_i32_1 = arith.constant 0 : i32
    return %c0_i32, %c0_i32_0 : i32, i32
  }
  func.func @transform_5(%arg0: i32) -> (i32, i32) {
    %c0_i32 = arith.constant 0 : i32
    %c0_i32_0 = arith.constant 0 : i32
    %c0_i32_1 = arith.constant 0 : i32
    return %c0_i32, %c0_i32_0 : i32, i32
  }
  func.func @transform_6(%arg0: i32) -> (i32, i32) {
    %c0_i32 = arith.constant 0 : i32
    %c0_i32_0 = arith.constant 0 : i32
    return %arg0, %c0_i32 : i32, i32
  }
}

module attributes {stable_mosaic.version = 11 : i64} {
  func.func @_bert_self_output_kernel(%arg0: i32, %arg1: memref<16x32xf32, #tpu.memory_space<vmem>>, %arg2: memref<16x32xf32, #tpu.memory_space<vmem>>, %arg3: memref<32x32xf32, #tpu.memory_space<vmem>>, %arg4: memref<1x32xf32, #tpu.memory_space<vmem>>, %arg5: memref<1x32xf32, #tpu.memory_space<vmem>>, %arg6: memref<1x32xf32, #tpu.memory_space<vmem>>, %arg7: memref<16x32xf32, #tpu.memory_space<vmem>>) attributes {dimension_semantics = [#tpu.dimension_semantics<parallel>], iteration_bounds = array<i64: 1>, scalar_prefetch = 0 : i64, scratch_operands = 0 : i64, tpu.core_type = #tpu.core_type<tc>, window_params = [{transform_indices = @transform_0, window_bounds = array<i64: 16, 32>}, {transform_indices = @transform_1, window_bounds = array<i64: 16, 32>}, {pipeline_mode = #tpu.pipeline_mode<synchronous>, transform_indices = @transform_2, window_bounds = array<i64: 32, 32>}, {pipeline_mode = #tpu.pipeline_mode<synchronous>, transform_indices = @transform_3, window_bounds = array<i64: 1, 32>}, {pipeline_mode = #tpu.pipeline_mode<synchronous>, transform_indices = @transform_4, window_bounds = array<i64: 1, 32>}, {pipeline_mode = #tpu.pipeline_mode<synchronous>, transform_indices = @transform_5, window_bounds = array<i64: 1, 32>}, {transform_indices = @transform_6, window_bounds = array<i64: 16, 32>}]} {
    %c0 = arith.constant 0 : index
    %c0_0 = arith.constant 0 : index
    %0 = vector.load %arg1[%c0, %c0_0] : memref<16x32xf32, #tpu.memory_space<vmem>>, vector<16x32xf32>
    %c0_1 = arith.constant 0 : index
    %c0_2 = arith.constant 0 : index
    %1 = vector.load %arg3[%c0_1, %c0_2] : memref<32x32xf32, #tpu.memory_space<vmem>>, vector<32x32xf32>
    %cst = arith.constant dense<0.000000e+00> : vector<16x32xf32>
    %2 = tpu.matmul %0, %1, %cst {dimension_numbers = #tpu.dot_dimension_numbers<[1], [0], [0], [1], [0, 0, 1, 1], [], []>} : vector<16x32xf32>, vector<32x32xf32>, vector<16x32xf32> -> vector<16x32xf32>
    %c0_3 = arith.constant 0 : index
    %c0_4 = arith.constant 0 : index
    %3 = vector.load %arg4[%c0_3, %c0_4] : memref<1x32xf32, #tpu.memory_space<vmem>>, vector<1x32xf32>
    %4 = vector.broadcast %3 : vector<1x32xf32> to vector<16x32xf32>
    %5 = arith.addf %2, %4 : vector<16x32xf32>
    %c0_5 = arith.constant 0 : index
    %c0_6 = arith.constant 0 : index
    %6 = vector.load %arg2[%c0_5, %c0_6] : memref<16x32xf32, #tpu.memory_space<vmem>>, vector<16x32xf32>
    %7 = arith.addf %5, %6 : vector<16x32xf32>
    %cst_7 = arith.constant dense<0.000000e+00> : vector<16xf32>
    %8 = vector.multi_reduction <add>, %7, %cst_7 [1] : vector<16x32xf32> to vector<16xf32>
    %9 = vector.shape_cast %8 : vector<16xf32> to vector<16x1xf32>
    %cst_8 = arith.constant 3.125000e-02 : f32
    %10 = vector.broadcast %cst_8 : f32 to vector<16x1xf32>
    %11 = arith.mulf %9, %10 : vector<16x1xf32>
    %12 = vector.broadcast %11 : vector<16x1xf32> to vector<16x32xf32>
    %13 = arith.subf %7, %12 : vector<16x32xf32>
    %14 = arith.mulf %13, %13 : vector<16x32xf32>
    %cst_9 = arith.constant dense<0.000000e+00> : vector<16xf32>
    %15 = vector.multi_reduction <add>, %14, %cst_9 [1] : vector<16x32xf32> to vector<16xf32>
    %16 = vector.shape_cast %15 : vector<16xf32> to vector<16x1xf32>
    %cst_10 = arith.constant 3.125000e-02 : f32
    %17 = vector.broadcast %cst_10 : f32 to vector<16x1xf32>
    %18 = arith.mulf %16, %17 : vector<16x1xf32>
    %cst_11 = arith.constant 9.99999996E-13 : f32
    %19 = vector.broadcast %cst_11 : f32 to vector<16x1xf32>
    %20 = arith.addf %18, %19 : vector<16x1xf32>
    %21 = math.rsqrt %20 : vector<16x1xf32>
    %22 = vector.broadcast %21 : vector<16x1xf32> to vector<16x32xf32>
    %23 = arith.mulf %13, %22 : vector<16x32xf32>
    %c0_12 = arith.constant 0 : index
    %c0_13 = arith.constant 0 : index
    %24 = vector.load %arg5[%c0_12, %c0_13] : memref<1x32xf32, #tpu.memory_space<vmem>>, vector<1x32xf32>
    %25 = vector.broadcast %24 : vector<1x32xf32> to vector<16x32xf32>
    %26 = arith.mulf %23, %25 : vector<16x32xf32>
    %c0_14 = arith.constant 0 : index
    %c0_15 = arith.constant 0 : index
    %27 = vector.load %arg6[%c0_14, %c0_15] : memref<1x32xf32, #tpu.memory_space<vmem>>, vector<1x32xf32>
    %28 = vector.broadcast %27 : vector<1x32xf32> to vector<16x32xf32>
    %29 = arith.addf %26, %28 : vector<16x32xf32>
    %c0_16 = arith.constant 0 : index
    %c0_17 = arith.constant 0 : index
    %30 = vector.load %arg7[%c0_16, %c0_17] : memref<16x32xf32, #tpu.memory_space<vmem>>, vector<16x32xf32>
    tpu.vector_store %arg7[%c0_16, %c0_17], %29 {strides = array<i32>} : memref<16x32xf32, #tpu.memory_space<vmem>>, vector<16x32xf32>,
    return
  }
  func.func @transform_0(%arg0: i32) -> (i32, i32) {
    %c0_i32 = arith.constant 0 : i32
    %c0_i32_0 = arith.constant 0 : i32
    return %arg0, %c0_i32 : i32, i32
  }
  func.func @transform_1(%arg0: i32) -> (i32, i32) {
    %c0_i32 = arith.constant 0 : i32
    %c0_i32_0 = arith.constant 0 : i32
    return %arg0, %c0_i32 : i32, i32
  }
  func.func @transform_2(%arg0: i32) -> (i32, i32) {
    %c0_i32 = arith.constant 0 : i32
    %c0_i32_0 = arith.constant 0 : i32
    %c0_i32_1 = arith.constant 0 : i32
    return %c0_i32, %c0_i32_0 : i32, i32
  }
  func.func @transform_3(%arg0: i32) -> (i32, i32) {
    %c0_i32 = arith.constant 0 : i32
    %c0_i32_0 = arith.constant 0 : i32
    %c0_i32_1 = arith.constant 0 : i32
    return %c0_i32, %c0_i32_0 : i32, i32
  }
  func.func @transform_4(%arg0: i32) -> (i32, i32) {
    %c0_i32 = arith.constant 0 : i32
    %c0_i32_0 = arith.constant 0 : i32
    %c0_i32_1 = arith.constant 0 : i32
    return %c0_i32, %c0_i32_0 : i32, i32
  }
  func.func @transform_5(%arg0: i32) -> (i32, i32) {
    %c0_i32 = arith.constant 0 : i32
    %c0_i32_0 = arith.constant 0 : i32
    %c0_i32_1 = arith.constant 0 : i32
    return %c0_i32, %c0_i32_0 : i32, i32
  }
  func.func @transform_6(%arg0: i32) -> (i32, i32) {
    %c0_i32 = arith.constant 0 : i32
    %c0_i32_0 = arith.constant 0 : i32
    return %arg0, %c0_i32 : i32, i32
  }
}

</mosaic_0001>

<bundles_post_ra>
// kernel: tpu_custom_call.1
= control target key start
LH: loop header
LB: loop body
LE: loop exit
PB: predicated region body
PF: predicated region fallthrough
CT: control target
= control target key end

     0   :  { %11 = vsyncpa [#allocation3], 0  ;;  %s487_s0 = inlined_call_operand.hbm [shape: f32[16,32], index: 0, kind: input, shape index: {}]   ;;  %s488_s1 = inlined_call_operand.hbm [shape: f32[16,32], index: 1, kind: input, shape index: {}]   ;;  %s489_s2 = inlined_call_operand.hbm [shape: f32[32,32], index: 2, kind: input, shape index: {}]   ;;  %s490_s3 = inlined_call_operand.vmem [shape: f32[1,32], index: 3, kind: input, shape index: {}]   ;;  %s491_s4 = inlined_call_operand.vmem [shape: f32[1,32], index: 4, kind: input, shape index: {}]   ;;  %s492_s5 = inlined_call_operand.vmem [shape: f32[1,32], index: 5, kind: input, shape index: {}]   ;;  %s493_s6 = inlined_call_operand.hbm [shape: f32[16,32], index: 6, kind: output, shape index: {}]  }
   0x1   :  { %12 = vsyncpa [#allocation6], 0 }
   0x2   :  { %13 = vsyncpa [#allocation4], 0  ;;  %s362_s21 = smov [#allocation5]   ;;  %s363_s23 = smov [#allocation2]  }
   0x3   :  { %s31_s22 = sshll.u32 %s362_s21, 4  ;;  %s19_s24 = sshll.u32 %s363_s23, 4  ;;  %s32_s22 = int_to_ptr.vmem [resolvable:$true] %s31_s22  ;;  %s403_s24 = int_to_ptr.vmem [resolvable:$true] %s19_s24 }
   0x4   :  { %s268_s27 = scalar_lea.hbm %s488_s1, 256 }
   0x5   :  { %p269_p0 = scmp.ne.s32.totalorder %s488_s1, %s268_s27  ;;  %p272_p1 = scmp.lt.u32.totalorder %s268_s27, %s488_s1 }
   0x7   :  { %p274_p2 = pnand %p272_p1, %p269_p0 }
   0x9   :  { %277 = shalt.err (!%p274_p2)
}
   0xa   :  { %s278_s8 = scalar_lea.vmem %s32_s22, 256  ;;  %p283_p4 = scmp.lt.s32.totalorder %s32_s22, %s32_s22 }
   0xb   :  { %p279_p3 = scmp.ne.s32.totalorder %s32_s22, %s278_s8  ;;  %p284_p5 = scmp.lt.s32.totalorder %s278_s8, %s278_s8 }
   0xd   :  { %p285_p6 = por %p284_p5, %p283_p4 }
   0xf   :  { %p286_p7 = pnand %p285_p6, %p279_p3 }
  0x11   :  { %289 = shalt.err (!%p286_p7)
}
  0x12   :  { %s364_s9 = smov 128   ;;  %s365_s10 = smov 8  }
  0x13   :  { %37 = dma.hbm_to_vmem [thread:$0]  %s488_s1, 256, %s32_s22, [#allocation6], %s364_s9, %s364_s9, %s365_s10  }
  0x14   :  { %s290_s15 = scalar_lea.hbm %s487_s0, 256 }
  0x15   :  { %p291_p8 = scmp.ne.s32.totalorder %s487_s0, %s290_s15  ;;  %p294_p9 = scmp.lt.u32.totalorder %s290_s15, %s487_s0 }
  0x17   :  { %p296_p10 = pnand %p294_p9, %p291_p8 }
  0x19   :  { %299 = shalt.err (!%p296_p10)
}
  0x1a   :  { %s300_s20 = scalar_lea.vmem %s403_s24, 256  ;;  %p305_p12 = scmp.lt.s32.totalorder %s403_s24, %s403_s24 }
  0x1b   :  { %p301_p11 = scmp.ne.s32.totalorder %s403_s24, %s300_s20  ;;  %p306_p13 = scmp.lt.s32.totalorder %s300_s20, %s300_s20 }
  0x1d   :  { %p307_p0 = por %p306_p13, %p305_p12 }
  0x1f   :  { %p308_p1 = pnand %p307_p0, %p301_p11 }
  0x21   :  { %311 = shalt.err (!%p308_p1)
}
  0x22   :  { %25 = dma.hbm_to_vmem [thread:$0]  %s487_s0, 256, %s403_s24, [#allocation3], %s364_s9, %s364_s9, %s365_s10  }
  0x23   :  { %s366_s22 = smov [#allocation7]   ;;  %s312_s27 = scalar_lea.hbm %s489_s2, 512 }
  0x24   :  { %s43_s23 = sshll.u32 %s366_s22, 4  ;;  %p313_p2 = scmp.ne.s32.totalorder %s489_s2, %s312_s27  ;;  %s44_s23 = int_to_ptr.vmem [resolvable:$true] %s43_s23 }
  0x25   :  { %p316_p3 = scmp.lt.u32.totalorder %s312_s27, %s489_s2 }
  0x27   :  { %p318_p4 = pnand %p316_p3, %p313_p2 }
  0x29   :  { %321 = shalt.err (!%p318_p4)
}
  0x2a   :  { %s322_s8 = scalar_lea.vmem %s44_s23, 512  ;;  %p327_p6 = scmp.lt.s32.totalorder %s44_s23, %s44_s23 }
  0x2b   :  { %p323_p5 = scmp.ne.s32.totalorder %s44_s23, %s322_s8  ;;  %p328_p7 = scmp.lt.s32.totalorder %s322_s8, %s322_s8 }
  0x2d   :  { %p329_p8 = por %p328_p7, %p327_p6 }
  0x2f   :  { %p330_p9 = pnand %p329_p8, %p323_p5 }
  0x31   :  { %333 = shalt.err (!%p330_p9)
}
  0x32   :  { %49 = dma.hbm_to_vmem [thread:$0]  %s489_s2, 512, %s44_s23, [#allocation6], %s364_s9, %s364_s9, %s365_s10  }
  0x33   :  { %356 = dma.done.wait [#allocation3], 256  }
  0x34   :  { %357 = vsyncadd [#allocation3], 4294967040 }
  0x35   :  { %358 = dma.done.wait [#allocation6], 768  }
  0x36   :  { %359 = vsyncadd [#allocation6], 4294966528  ;;  %vm78_vm0 = vcmask 261120   ;;  %v67_v0 = vld [vmem:[#allocation7] sm:$0xff]  ;;  %v68_v1 = vld [vmem:[#allocation7 + $0x8] sm:$0xff]  ;;  %s367_s15 = smov [#allocation8]  }
  0x37   :  { %v69_v2 = vld [vmem:[#allocation7 + $0x10] sm:$0xff]  ;;  %v250_v3 = vpack.c.bf16 %v68_v1, %v67_v0  ;;  %v70_v4 = vld [vmem:[#allocation7 + $0x18] sm:$0xff]  ;;  %v65_v5 = vld [vmem:[#allocation2] sm:$0xff]  ;;  %s215_s16 = sshll.u32 %s367_s15, 4  ;;  %s216_s16 = int_to_ptr.vmem [resolvable:$true] %s215_s16 }
  0x38   :  { %v254_v6 = vpack.c.bf16 %v70_v4, %v69_v2  ;;  %247 = vmatprep.mubr.msk.f32.mxu0 %vm78_vm0, %v65_v5  ;;  %v66_v7 = vld [vmem:[#allocation2 + $0x8] sm:$0xff]  ;;  %v228_v8 = vld [vmem:[%s490_s3] ss:$0 sm:$0xff]  ;;  %v160_v11 = vld [vmem:[#allocation5] sm:$0xff]  ;;  %s334_s17 = scalar_lea.vmem %s216_s16, 256  ;;  %p339_p11 = scmp.lt.s32.totalorder %s216_s16, %s216_s16 }
  0x39   :  { %251 = vmatprep.subr.bf16.mxu0 %v250_v3  ;;  %v161_v14 = vld [vmem:[#allocation5 + $0x8] sm:$0xff]  ;;  %v231_v36 = vld [vmem:[%s491_s4] ss:$0 sm:$0xff]  ;;  %p335_p10 = scmp.ne.s32.totalorder %s216_s16, %s334_s17  ;;  %p340_p12 = scmp.lt.s32.totalorder %s334_s17, %s334_s17 }
  0x3a   :  { %253 = vmatpush3.bf16.msra.mxu0 %v250_v3  ;;  %v232_v38 = vld [vmem:[%s492_s5] ss:$0 sm:$0xff] }
  0x3b   :  { %255 = vmatprep.subr.bf16.mxu0 %v254_v6  ;;  %p341_p13 = por %p340_p12, %p339_p11 }
  0x3d   :  { %p342_p0 = pnand %p341_p13, %p335_p10 }
  0x3e   :  { %257 = vmatpush3.bf16.msra.mxu0 %v254_v6 }
  0x41   :  { %248 = vmatmul.mubr.msk.f32.vlgmr.msra.gmra.mrb[0].mxu0 %vm78_vm0, %v66_v7 }
 0x114   :  { %v249_v9 = vpop.f32.mrb[0].mxu0 }
 0x115   :  { %v151_v10 = vpop.f32.mrb[1].mxu0  ;;  %v157_v12 = vadd.f32 %v249_v9, %v228_v8 }
 0x116   :  { %v152_v13 = vadd.f32 %v228_v8, %v151_v10 }
 0x117   :  { %v163_v17 = vadd.f32 %v161_v14, %v157_v12 }
 0x118   :  { %v162_v15 = vadd.f32 %v160_v11, %v152_v13 }
 0x119   :  { %v167_v18 = vsel %vm78_vm0, %v163_v17, 0.0 }
 0x11a   :  { %v164_v16 = vsel %vm78_vm0, %v162_v15, 0.0 }
 0x11b   :  { %165 = vadd.xlane.f32.xlu0 %v164_v16 }
 0x11f   :  { %168 = vadd.xlane.f32.xlu0 %v167_v18 }
 0x1a8   :  { %v166_v19 = vpop.xlane.xlu0 %165 }
 0x1a9   :  { %v170_v20 = vmul.f32 0.03125, %v166_v19 }
 0x1ab   :  { %v172_v21 = vsub.f32 %v162_v15, %v170_v20 }
 0x1ac   :  { %v169_v22 = vpop.xlane.xlu0 %168 }
 0x1ad   :  { %v171_v23 = vmul.f32 0.03125, %v169_v22  ;;  %v174_v24 = vmul.f32 %v172_v21, %v172_v21 }
 0x1af   :  { %v173_v25 = vsub.f32 %v163_v17, %v171_v23  ;;  %v176_v26 = vsel %vm78_vm0, %v174_v24, 0.0 }
 0x1b0   :  { %177 = vadd.xlane.f32.xlu1 %v176_v26 }
 0x1b1   :  { %v175_v27 = vmul.f32 %v173_v25, %v173_v25 }
 0x1b3   :  { %v179_v28 = vsel %vm78_vm0, %v175_v27, 0.0 }
 0x1b4   :  { %180 = vadd.xlane.f32.xlu1 %v179_v28 }
 0x23d   :  { %v178_v29 = vpop.xlane.xlu1 %177 }
 0x23e   :  { %v182_v30 = vmul.f32 0.03125, %v178_v29 }
 0x240   :  { %v184_v31 = vadd.f32 1e-12, %v182_v30 }
 0x241   :  { %v181_v32 = vpop.xlane.xlu1 %180 }
 0x242   :  { %264 = vrsqrt.f32 %v184_v31  ;;  %v183_v33 = vmul.f32 0.03125, %v181_v32 }
 0x244   :  { %v185_v34 = vadd.f32 1e-12, %v183_v33 }
 0x246   :  { %266 = vrsqrt.f32 %v185_v34 }
 0x24c   :  { %v265_v35 = vpop.eup %264 }
 0x24d   :  { %v188_v37 = vmul.f32 %v265_v35, %v172_v21 }
 0x24f   :  { %v197_v39 = vmul.f32 %v231_v36, %v188_v37 }
 0x250   :  { %v267_v40 = vpop.eup %266 }
 0x251   :  { %v189_v41 = vmul.f32 %v267_v40, %v173_v25  ;;  %v206_v42 = vadd.f32 %v232_v38, %v197_v39 }
 0x253   :  { %v198_v43 = vmul.f32 %v231_v36, %v189_v41  ;;  %208 = vst.msk [vmem:[#allocation8] sm:$0xff] %vm78_vm0, %v206_v42 }
 0x255   :  { %v207_v44 = vadd.f32 %v232_v38, %v198_v43 }
 0x257   :  { %209 = vst.msk [vmem:[#allocation8 + $0x8] sm:$0xff] %vm78_vm0, %v207_v44 }
 0x258   :  { %345 = shalt.err (!%p342_p0)
}
 0x259   :  { %s346_s18 = scalar_lea.hbm %s493_s6, 256 }
 0x25a   :  { %p347_p1 = scmp.ne.s32.totalorder %s493_s6, %s346_s18  ;;  %p350_p2 = scmp.lt.u32.totalorder %s346_s18, %s493_s6 }
 0x25c   :  { %p352_p3 = pnand %p350_p2, %p347_p1 }
 0x25e   :  { %355 = shalt.err (!%p352_p3)
}
 0x25f   :  { %221 = dma.vmem_to_hbm [thread:$0]  %s216_s16, 256, %s493_s6, [#allocation4], %s364_s9, %s364_s9, %s365_s10  }
 0x260   :  { %360 = dma.done.wait [#allocation4], 256  }
 0x261   :  { %361 = vsyncadd [#allocation4], 4294967040 }
 0x262   :  { %225 = vsyncpa [#allocation3], 1 }
 0x263   :  { %226 = vsyncpa [#allocation6], 1 }
 0x264   :  { %227 = vsyncpa [#allocation4], 1 }

// kernel: tpu_custom_call.1
= control target key start
LH: loop header
LB: loop body
LE: loop exit
PB: predicated region body
PF: predicated region fallthrough
CT: control target
= control target key end

     0   :  { %11 = vsyncpa [#allocation3], 0  ;;  %s487_s0 = inlined_call_operand.hbm [shape: f32[16,32], index: 0, kind: input, shape index: {}]   ;;  %s488_s1 = inlined_call_operand.hbm [shape: f32[16,32], index: 1, kind: input, shape index: {}]   ;;  %s489_s2 = inlined_call_operand.hbm [shape: f32[32,32], index: 2, kind: input, shape index: {}]   ;;  %s490_s3 = inlined_call_operand.vmem [shape: f32[1,32], index: 3, kind: input, shape index: {}]   ;;  %s491_s4 = inlined_call_operand.vmem [shape: f32[1,32], index: 4, kind: input, shape index: {}]   ;;  %s492_s5 = inlined_call_operand.vmem [shape: f32[1,32], index: 5, kind: input, shape index: {}]   ;;  %s493_s6 = inlined_call_operand.hbm [shape: f32[16,32], index: 6, kind: output, shape index: {}]  }
   0x1   :  { %12 = vsyncpa [#allocation6], 0 }
   0x2   :  { %13 = vsyncpa [#allocation4], 0  ;;  %s362_s21 = smov [#allocation5]   ;;  %s363_s23 = smov [#allocation2]  }
   0x3   :  { %s31_s22 = sshll.u32 %s362_s21, 4  ;;  %s19_s24 = sshll.u32 %s363_s23, 4  ;;  %s32_s22 = int_to_ptr.vmem [resolvable:$true] %s31_s22  ;;  %s403_s24 = int_to_ptr.vmem [resolvable:$true] %s19_s24 }
   0x4   :  { %s268_s27 = scalar_lea.hbm %s488_s1, 256 }
   0x5   :  { %p269_p0 = scmp.ne.s32.totalorder %s488_s1, %s268_s27  ;;  %p272_p1 = scmp.lt.u32.totalorder %s268_s27, %s488_s1 }
   0x7   :  { %p274_p2 = pnand %p272_p1, %p269_p0 }
   0x9   :  { %277 = shalt.err (!%p274_p2)
}
   0xa   :  { %s278_s8 = scalar_lea.vmem %s32_s22, 256  ;;  %p283_p4 = scmp.lt.s32.totalorder %s32_s22, %s32_s22 }
   0xb   :  { %p279_p3 = scmp.ne.s32.totalorder %s32_s22, %s278_s8  ;;  %p284_p5 = scmp.lt.s32.totalorder %s278_s8, %s278_s8 }
   0xd   :  { %p285_p6 = por %p284_p5, %p283_p4 }
   0xf   :  { %p286_p7 = pnand %p285_p6, %p279_p3 }
  0x11   :  { %289 = shalt.err (!%p286_p7)
}
  0x12   :  { %s364_s9 = smov 128   ;;  %s365_s10 = smov 8  }
  0x13   :  { %37 = dma.hbm_to_vmem [thread:$0]  %s488_s1, 256, %s32_s22, [#allocation6], %s364_s9, %s364_s9, %s365_s10  }
  0x14   :  { %s290_s15 = scalar_lea.hbm %s487_s0, 256 }
  0x15   :  { %p291_p8 = scmp.ne.s32.totalorder %s487_s0, %s290_s15  ;;  %p294_p9 = scmp.lt.u32.totalorder %s290_s15, %s487_s0 }
  0x17   :  { %p296_p10 = pnand %p294_p9, %p291_p8 }
  0x19   :  { %299 = shalt.err (!%p296_p10)
}
  0x1a   :  { %s300_s20 = scalar_lea.vmem %s403_s24, 256  ;;  %p305_p12 = scmp.lt.s32.totalorder %s403_s24, %s403_s24 }
  0x1b   :  { %p301_p11 = scmp.ne.s32.totalorder %s403_s24, %s300_s20  ;;  %p306_p13 = scmp.lt.s32.totalorder %s300_s20, %s300_s20 }
  0x1d   :  { %p307_p0 = por %p306_p13, %p305_p12 }
  0x1f   :  { %p308_p1 = pnand %p307_p0, %p301_p11 }
  0x21   :  { %311 = shalt.err (!%p308_p1)
}
  0x22   :  { %25 = dma.hbm_to_vmem [thread:$0]  %s487_s0, 256, %s403_s24, [#allocation3], %s364_s9, %s364_s9, %s365_s10  }
  0x23   :  { %s366_s22 = smov [#allocation7]   ;;  %s312_s27 = scalar_lea.hbm %s489_s2, 512 }
  0x24   :  { %s43_s23 = sshll.u32 %s366_s22, 4  ;;  %p313_p2 = scmp.ne.s32.totalorder %s489_s2, %s312_s27  ;;  %s44_s23 = int_to_ptr.vmem [resolvable:$true] %s43_s23 }
  0x25   :  { %p316_p3 = scmp.lt.u32.totalorder %s312_s27, %s489_s2 }
  0x27   :  { %p318_p4 = pnand %p316_p3, %p313_p2 }
  0x29   :  { %321 = shalt.err (!%p318_p4)
}
  0x2a   :  { %s322_s8 = scalar_lea.vmem %s44_s23, 512  ;;  %p327_p6 = scmp.lt.s32.totalorder %s44_s23, %s44_s23 }
  0x2b   :  { %p323_p5 = scmp.ne.s32.totalorder %s44_s23, %s322_s8  ;;  %p328_p7 = scmp.lt.s32.totalorder %s322_s8, %s322_s8 }
  0x2d   :  { %p329_p8 = por %p328_p7, %p327_p6 }
  0x2f   :  { %p330_p9 = pnand %p329_p8, %p323_p5 }
  0x31   :  { %333 = shalt.err (!%p330_p9)
}
  0x32   :  { %49 = dma.hbm_to_vmem [thread:$0]  %s489_s2, 512, %s44_s23, [#allocation6], %s364_s9, %s364_s9, %s365_s10  }
  0x33   :  { %356 = dma.done.wait [#allocation3], 256  }
  0x34   :  { %357 = vsyncadd [#allocation3], 4294967040 }
  0x35   :  { %358 = dma.done.wait [#allocation6], 768  }
  0x36   :  { %359 = vsyncadd [#allocation6], 4294966528  ;;  %vm78_vm0 = vcmask 261120   ;;  %v67_v0 = vld [vmem:[#allocation7] sm:$0xff]  ;;  %v68_v1 = vld [vmem:[#allocation7 + $0x8] sm:$0xff]  ;;  %s367_s15 = smov [#allocation8]  }
  0x37   :  { %v69_v2 = vld [vmem:[#allocation7 + $0x10] sm:$0xff]  ;;  %v250_v3 = vpack.c.bf16 %v68_v1, %v67_v0  ;;  %v70_v4 = vld [vmem:[#allocation7 + $0x18] sm:$0xff]  ;;  %v65_v5 = vld [vmem:[#allocation2] sm:$0xff]  ;;  %s215_s16 = sshll.u32 %s367_s15, 4  ;;  %s216_s16 = int_to_ptr.vmem [resolvable:$true] %s215_s16 }
  0x38   :  { %v254_v6 = vpack.c.bf16 %v70_v4, %v69_v2  ;;  %247 = vmatprep.mubr.msk.f32.mxu0 %vm78_vm0, %v65_v5  ;;  %v66_v7 = vld [vmem:[#allocation2 + $0x8] sm:$0xff]  ;;  %v228_v8 = vld [vmem:[%s490_s3] ss:$0 sm:$0xff]  ;;  %v160_v11 = vld [vmem:[#allocation5] sm:$0xff]  ;;  %s334_s17 = scalar_lea.vmem %s216_s16, 256  ;;  %p339_p11 = scmp.lt.s32.totalorder %s216_s16, %s216_s16 }
  0x39   :  { %251 = vmatprep.subr.bf16.mxu0 %v250_v3  ;;  %v161_v14 = vld [vmem:[#allocation5 + $0x8] sm:$0xff]  ;;  %v231_v36 = vld [vmem:[%s491_s4] ss:$0 sm:$0xff]  ;;  %p335_p10 = scmp.ne.s32.totalorder %s216_s16, %s334_s17  ;;  %p340_p12 = scmp.lt.s32.totalorder %s334_s17, %s334_s17 }
  0x3a   :  { %253 = vmatpush3.bf16.msra.mxu0 %v250_v3  ;;  %v232_v38 = vld [vmem:[%s492_s5] ss:$0 sm:$0xff] }
  0x3b   :  { %255 = vmatprep.subr.bf16.mxu0 %v254_v6  ;;  %p341_p13 = por %p340_p12, %p339_p11 }
  0x3d   :  { %p342_p0 = pnand %p341_p13, %p335_p10 }
  0x3e   :  { %257 = vmatpush3.bf16.msra.mxu0 %v254_v6 }
  0x41   :  { %248 = vmatmul.mubr.msk.f32.vlgmr.msra.gmra.mrb[0].mxu0 %vm78_vm0, %v66_v7 }
 0x114   :  { %v249_v9 = vpop.f32.mrb[0].mxu0 }
 0x115   :  { %v151_v10 = vpop.f32.mrb[1].mxu0  ;;  %v157_v12 = vadd.f32 %v249_v9, %v228_v8 }
 0x116   :  { %v152_v13 = vadd.f32 %v228_v8, %v151_v10 }
 0x117   :  { %v163_v17 = vadd.f32 %v161_v14, %v157_v12 }
 0x118   :  { %v162_v15 = vadd.f32 %v160_v11, %v152_v13 }
 0x119   :  { %v167_v18 = vsel %vm78_vm0, %v163_v17, 0.0 }
 0x11a   :  { %v164_v16 = vsel %vm78_vm0, %v162_v15, 0.0 }
 0x11b   :  { %165 = vadd.xlane.f32.xlu0 %v164_v16 }
 0x11f   :  { %168 = vadd.xlane.f32.xlu0 %v167_v18 }
 0x1a8   :  { %v166_v19 = vpop.xlane.xlu0 %165 }
 0x1a9   :  { %v170_v20 = vmul.f32 0.03125, %v166_v19 }
 0x1ab   :  { %v172_v21 = vsub.f32 %v162_v15, %v170_v20 }
 0x1ac   :  { %v169_v22 = vpop.xlane.xlu0 %168 }
 0x1ad   :  { %v171_v23 = vmul.f32 0.03125, %v169_v22  ;;  %v174_v24 = vmul.f32 %v172_v21, %v172_v21 }
 0x1af   :  { %v173_v25 = vsub.f32 %v163_v17, %v171_v23  ;;  %v176_v26 = vsel %vm78_vm0, %v174_v24, 0.0 }
 0x1b0   :  { %177 = vadd.xlane.f32.xlu1 %v176_v26 }
 0x1b1   :  { %v175_v27 = vmul.f32 %v173_v25, %v173_v25 }
 0x1b3   :  { %v179_v28 = vsel %vm78_vm0, %v175_v27, 0.0 }
 0x1b4   :  { %180 = vadd.xlane.f32.xlu1 %v179_v28 }
 0x23d   :  { %v178_v29 = vpop.xlane.xlu1 %177 }
 0x23e   :  { %v182_v30 = vmul.f32 0.03125, %v178_v29 }
 0x240   :  { %v184_v31 = vadd.f32 1e-12, %v182_v30 }
 0x241   :  { %v181_v32 = vpop.xlane.xlu1 %180 }
 0x242   :  { %264 = vrsqrt.f32 %v184_v31  ;;  %v183_v33 = vmul.f32 0.03125, %v181_v32 }
 0x244   :  { %v185_v34 = vadd.f32 1e-12, %v183_v33 }
 0x246   :  { %266 = vrsqrt.f32 %v185_v34 }
 0x24c   :  { %v265_v35 = vpop.eup %264 }
 0x24d   :  { %v188_v37 = vmul.f32 %v265_v35, %v172_v21 }
 0x24f   :  { %v197_v39 = vmul.f32 %v231_v36, %v188_v37 }
 0x250   :  { %v267_v40 = vpop.eup %266 }
 0x251   :  { %v189_v41 = vmul.f32 %v267_v40, %v173_v25  ;;  %v206_v42 = vadd.f32 %v232_v38, %v197_v39 }
 0x253   :  { %v198_v43 = vmul.f32 %v231_v36, %v189_v41  ;;  %208 = vst.msk [vmem:[#allocation8] sm:$0xff] %vm78_vm0, %v206_v42 }
 0x255   :  { %v207_v44 = vadd.f32 %v232_v38, %v198_v43 }
 0x257   :  { %209 = vst.msk [vmem:[#allocation8 + $0x8] sm:$0xff] %vm78_vm0, %v207_v44 }
 0x258   :  { %345 = shalt.err (!%p342_p0)
}
 0x259   :  { %s346_s18 = scalar_lea.hbm %s493_s6, 256 }
 0x25a   :  { %p347_p1 = scmp.ne.s32.totalorder %s493_s6, %s346_s18  ;;  %p350_p2 = scmp.lt.u32.totalorder %s346_s18, %s493_s6 }
 0x25c   :  { %p352_p3 = pnand %p350_p2, %p347_p1 }
 0x25e   :  { %355 = shalt.err (!%p352_p3)
}
 0x25f   :  { %221 = dma.vmem_to_hbm [thread:$0]  %s216_s16, 256, %s493_s6, [#allocation4], %s364_s9, %s364_s9, %s365_s10  }
 0x260   :  { %360 = dma.done.wait [#allocation4], 256  }
 0x261   :  { %361 = vsyncadd [#allocation4], 4294967040 }
 0x262   :  { %225 = vsyncpa [#allocation3], 1 }
 0x263   :  { %226 = vsyncpa [#allocation6], 1 }
 0x264   :  { %227 = vsyncpa [#allocation4], 1 }

</bundles_post_ra>
